<compile_context>
chip_gen: v7x
topology: tpu7x:2x2x1
jax: 0.10.0
libtpu: 0.0.40
codegen_flags: <defaults>
</compile_context>

<pallas_src>
import functools
import math

import jax
import jax.numpy as jnp
from jax.experimental import pallas as pl
from jax.experimental.pallas import tpu as pltpu

# ---- BlendParams defaults (pytorch3d) -------------------------------------
SIGMA = 1e-4
GAMMA = 1e-4
BACKGROUND = (1.0, 1.0, 1.0)
ZNEAR = 1.0
ZFAR = 100.0
EPS = 1e-10


def _round_up(x, m):
    return (x + m - 1) // m * m


def _recip(x):
    # approx EUP vrcp + one Newton-Raphson refinement (~2^-24 relative error),
    # much cheaper than an exact f32 divide and well inside 1e-4 tolerance.
    r = pl.reciprocal(x, approx=True)
    return r * (2.0 - x * r)


# ---------------------------------------------------------------------------
# Pallas kernel: softmax RGB blend over pre-interpolated normal colors.
#   col_ref  : (3K, T)  row = c*K + k   barycentric-interpolated normals (RGB)
#   scal_ref : (2K, T)  rows [dists | zbuf], mask already folded in
#   out_ref  : (4, T)   RGBA
# ---------------------------------------------------------------------------
def _shader_kernel(col_ref, scal_ref, out_ref, *,
                   K, inv_sigma, inv_gamma, background, inv_zrange, zfar,
                   delta_c):
    dists = scal_ref[pl.ds(0, K), :]          # masked entries pre-folded to +BIG
    zbuf = scal_ref[pl.ds(K, K), :]           # masked entries pre-folded to zfar

    # prob = sigmoid(-dists/sigma); clamp exp arg so the +BIG fold stays finite
    # (exp(80) is finite, its reciprocal is ~0, matching prob*mask == 0).
    e = jnp.exp(jnp.minimum(dists * inv_sigma, 80.0))         # (K, T)
    prob = _recip(1.0 + e)                                    # (K, T)

    # alpha = prod_k (1 - prob_k); K is tiny -> unrolled VPU multiplies.
    one_minus = 1.0 - prob
    alpha = one_minus[0:1]
    for k in range(1, K):
        alpha = alpha * one_minus[k:k + 1]                    # (1, T)

    z_inv = (zfar - zbuf) * inv_zrange                        # (K, T), masked -> 0
    z_max = jnp.max(z_inv, axis=0, keepdims=True)             # (1, T)

    # opacity is identically 1.0 in SoftNormalShader
    w_num = prob * jnp.exp((z_inv - z_max) * inv_gamma)       # (K, T)
    delta = jnp.maximum(jnp.exp(-z_max * inv_gamma) * delta_c, EPS)   # (1, T)
    denom = jnp.sum(w_num, axis=0, keepdims=True) + delta     # (1, T)
    inv_denom = _recip(denom)                                 # (1, T)

    rows = []
    for c in range(3):
        col = col_ref[pl.ds(c * K, K), :]                     # (K, T)
        # w_num carries the pix_to_face>=0 mask (prob==0 there), so invalid
        # faces drop out of the weighted sum.
        wc = jnp.sum(w_num * col, axis=0, keepdims=True)      # (1, T)
        rows.append((wc + delta * background[c]) * inv_denom)
    rows.append(1.0 - alpha)

    out_ref[...] = jnp.concatenate(rows, axis=0)              # single (4, T) store


# ---------------------------------------------------------------------------
# Wrapper: fused gather + barycentric interpolation, mask fold, layout glue.
# ---------------------------------------------------------------------------
def soft_normal_shader(faces_normals, pix_to_face, bary_coords, dists, zbuf,
                       *, sigma=SIGMA, gamma=GAMMA, background=BACKGROUND,
                       znear=ZNEAR, zfar=ZFAR, tile=16384):
    N, H, W, K = pix_to_face.shape
    P = N * H * W
    f32 = jnp.float32

    # Lane tile: large by default (mem-bound streaming kernel), but
    #  * capped so the grid has at least 2 steps (both v7x TensorCores get
    #    work via dimension_semantics=("parallel",)),
    #  * always a multiple of 128, at least 128.
    half = _round_up((P + 1) // 2, 128)
    tile = max(128, min(int(tile), half))
    tile = _round_up(tile, 128)
    Pp = _round_up(P, tile)
    pad = Pp - P

    p2f = pix_to_face.reshape(P, K)
    mask = p2f >= 0                                                     # (P, K)
    safe = jnp.where(mask, p2f, 0).astype(jnp.int32)                    # (P, K)

    # Fused gather + barycentric weighted sum (one XLA fusion): produce the
    # interpolated colors directly in the kernel layout (3c, K, P).
    # TODO(synk): the per-pixel face gather has no fast in-kernel TPU path
    # (would need one-hot MXU), so it stays in the XLA wrapper.
    bary_t = bary_coords.astype(f32).reshape(P, K, 3).transpose(2, 1, 0)  # (3v,K,P)
    fn_g = faces_normals.astype(f32).transpose(1, 2, 0)[:, :, safe.T]     # (3v,3c,K,P)
    col_t = jnp.sum(bary_t[:, None] * fn_g, axis=0).reshape(3 * K, P)     # row=c*K+k

    # Fold the mask into dists/zbuf: masked -> prob = 0 and z_inv = 0 in-kernel
    # (also hardens against NaN/garbage at masked pixels).
    dists_m = jnp.where(mask, dists.astype(f32).reshape(P, K), f32(1e30))
    zbuf_m = jnp.where(mask, zbuf.astype(f32).reshape(P, K), f32(zfar))
    scal_t = (jnp.stack([dists_m, zbuf_m], axis=0)                      # (2, P, K)
              .transpose(0, 2, 1).reshape(2 * K, P))                    # row = s*K+k

    if pad:
        col_t = jnp.pad(col_t, ((0, 0), (0, pad)))
        scal_t = jnp.pad(scal_t, ((0, 0), (0, pad)))

    kernel = functools.partial(
        _shader_kernel, K=K,
        inv_sigma=float(1.0 / sigma), inv_gamma=float(1.0 / gamma),
        background=tuple(float(b) for b in background),
        inv_zrange=float(1.0 / (zfar - znear)), zfar=float(zfar),
        delta_c=float(math.exp(EPS / gamma)))

    out = pl.pallas_call(
        kernel,
        out_shape=jax.ShapeDtypeStruct((4, Pp), jnp.float32),
        grid=(Pp // tile,),
        in_specs=[
            pl.BlockSpec((3 * K, tile), lambda i: (0, i)),   # interpolated colors
            pl.BlockSpec((2 * K, tile), lambda i: (0, i)),   # dists | zbuf
        ],
        out_specs=pl.BlockSpec((4, tile), lambda i: (0, i)),
        compiler_params=pltpu.CompilerParams(
            dimension_semantics=("parallel",),
            vmem_limit_bytes=32 * 1024 * 1024),
    )(col_t, scal_t)

    return out[:, :P].T.reshape(N, H, W, 4)


# ---------------------------------------------------------------------------
# Pure-JAX reference (mirrors the PyTorch semantics) for verification
# ---------------------------------------------------------------------------
def _reference(faces_normals, p2f, bary, dists, zbuf,
               sigma=SIGMA, gamma=GAMMA, background=BACKGROUND,
               znear=ZNEAR, zfar=ZFAR):
    mask = p2f >= 0
    fn = faces_normals[jnp.where(mask, p2f, 0)]                   # (N,H,W,K,3,3)
    colors = (bary[..., None] * fn).sum(-2)                       # (N,H,W,K,3)
    colors = jnp.where(mask[..., None], colors, 0.0)
    maskf = mask.astype(jnp.float32)
    prob = jax.nn.sigmoid(-dists / sigma) * maskf
    alpha = jnp.prod(1.0 - prob, axis=-1)
    z_inv = (zfar - zbuf) / (zfar - znear) * maskf
    z_max = z_inv.max(-1, keepdims=True)
    w = prob * jnp.exp((z_inv - z_max) / gamma)                   # opacity == 1
    delta = jnp.maximum(jnp.exp((EPS - z_max) / gamma), EPS)
    denom = w.sum(-1, keepdims=True) + delta
    rgb = ((w[..., None] * colors).sum(-2)
           + delta * jnp.asarray(background, jnp.float32)) / denom
    return jnp.concatenate([rgb, (1.0 - alpha)[..., None]], axis=-1)


if __name__ == "__main__":
    key = jax.random.PRNGKey(0)
    N, H, W, K = 2, 16, 16, 4          # batch, image H/W, faces-per-pixel
    V, F = 12, 20                       # vertices, faces (synthetic mesh)
    k1, k2, k3, k4, k5, k6 = jax.random.split(key, 6)

    vnorm = jax.random.normal(k1, (V, 3), jnp.float32)
    vnorm = vnorm / jnp.linalg.norm(vnorm, axis=-1, keepdims=True)
    faces = jax.random.randint(k2, (F, 3), 0, V)
    faces_normals = vnorm[faces]                                  # (F, 3, 3)

    pix_to_face = jax.random.randint(k3, (N, H, W, K), -1, F)     # -1 => empty
    bary = jax.random.uniform(k4, (N, H, W, K, 3), jnp.float32, 1e-3, 1.0)
    bary = bary / bary.sum(-1, keepdims=True)
    dists = jax.random.uniform(k5, (N, H, W, K), jnp.float32, -3e-4, 3e-4)
    zbuf = jax.random.uniform(k6, (N, H, W, K), jnp.float32, ZNEAR, 10.0)

    shader = jax.jit(soft_normal_shader)
    out = shader(faces_normals, pix_to_face, bary, dists, zbuf)
    out = jax.block_until_ready(out)

    ref = _reference(faces_normals, pix_to_face, bary, dists, zbuf)

    assert out.shape == (N, H, W, 4), out.shape
    if bool(jnp.allclose(out, ref, atol=1e-4, rtol=1e-4)):
        print("KERNEL_OK")
    else:
        print("MISMATCH: max abs err =", float(jnp.max(jnp.abs(out - ref))))
</pallas_src>

<mosaic_0001>
module attributes {stable_mosaic.version = 11 : i64} {
  func.func @_shader_kernel(%arg0: i32, %arg1: memref<12x256xf32, #tpu.memory_space<vmem>>, %arg2: memref<8x256xf32, #tpu.memory_space<vmem>>, %arg3: memref<4x256xf32, #tpu.memory_space<vmem>>) attributes {dimension_semantics = [#tpu.dimension_semantics<parallel>], iteration_bounds = array<i64: 2>, scalar_prefetch = 0 : i64, scratch_operands = 0 : i64, tpu.core_type = #tpu.core_type<tc>, window_params = [{transform_indices = @transform_0, window_bounds = array<i64: 12, 256>}, {transform_indices = @transform_1, window_bounds = array<i64: 8, 256>}, {transform_indices = @transform_2, window_bounds = array<i64: 4, 256>}]} {
    %c0 = arith.constant 0 : index
    %c0_0 = arith.constant 0 : index
    %0 = vector.load %arg2[%c0, %c0_0] : memref<8x256xf32, #tpu.memory_space<vmem>>, vector<4x256xf32>
    %c4 = arith.constant 4 : index
    %c0_1 = arith.constant 0 : index
    %1 = vector.load %arg2[%c4, %c0_1] : memref<8x256xf32, #tpu.memory_space<vmem>>, vector<4x256xf32>
    %cst = arith.constant 1.000000e+04 : f32
    %2 = vector.broadcast %cst : f32 to vector<4x256xf32>
    %3 = arith.mulf %0, %2 : vector<4x256xf32>
    %cst_2 = arith.constant 8.000000e+01 : f32
    %4 = vector.broadcast %cst_2 : f32 to vector<4x256xf32>
    %5 = arith.minimumf %3, %4 : vector<4x256xf32>
    %6 = math.exp %5 : vector<4x256xf32>
    %cst_3 = arith.constant 1.000000e+00 : f32
    %7 = vector.broadcast %cst_3 : f32 to vector<4x256xf32>
    %8 = arith.addf %7, %6 : vector<4x256xf32>
    %9 = tpu.reciprocal %8 {approx = true} : vector<4x256xf32> -> vector<4x256xf32>
    %10 = arith.mulf %8, %9 : vector<4x256xf32>
    %cst_4 = arith.constant 2.000000e+00 : f32
    %11 = vector.broadcast %cst_4 : f32 to vector<4x256xf32>
    %12 = arith.subf %11, %10 : vector<4x256xf32>
    %13 = arith.mulf %9, %12 : vector<4x256xf32>
    %cst_5 = arith.constant 1.000000e+00 : f32
    %14 = vector.broadcast %cst_5 : f32 to vector<4x256xf32>
    %15 = arith.subf %14, %13 : vector<4x256xf32>
    %16 = vector.extract_strided_slice %15 {offsets = [0, 0], sizes = [1, 256], strides = [1, 1]} : vector<4x256xf32> to vector<1x256xf32>
    %17 = vector.extract_strided_slice %15 {offsets = [1, 0], sizes = [1, 256], strides = [1, 1]} : vector<4x256xf32> to vector<1x256xf32>
    %18 = arith.mulf %16, %17 : vector<1x256xf32>
    %19 = vector.extract_strided_slice %15 {offsets = [2, 0], sizes = [1, 256], strides = [1, 1]} : vector<4x256xf32> to vector<1x256xf32>
    %20 = arith.mulf %18, %19 : vector<1x256xf32>
    %21 = vector.extract_strided_slice %15 {offsets = [3, 0], sizes = [1, 256], strides = [1, 1]} : vector<4x256xf32> to vector<1x256xf32>
    %22 = arith.mulf %20, %21 : vector<1x256xf32>
    %cst_6 = arith.constant 1.000000e+02 : f32
    %23 = vector.broadcast %cst_6 : f32 to vector<4x256xf32>
    %24 = arith.subf %23, %1 : vector<4x256xf32>
    %cst_7 = arith.constant 0.0101010101 : f32
    %25 = vector.broadcast %cst_7 : f32 to vector<4x256xf32>
    %26 = arith.mulf %24, %25 : vector<4x256xf32>
    %cst_8 = arith.constant dense<0xFF800000> : vector<256xf32>
    %27 = vector.multi_reduction <maximumf>, %26, %cst_8 [0] : vector<4x256xf32> to vector<256xf32>
    %28 = vector.shape_cast %27 : vector<256xf32> to vector<1x256xf32>
    %29 = vector.broadcast %28 : vector<1x256xf32> to vector<4x256xf32>
    %30 = arith.subf %26, %29 : vector<4x256xf32>
    %cst_9 = arith.constant 1.000000e+04 : f32
    %31 = vector.broadcast %cst_9 : f32 to vector<4x256xf32>
    %32 = arith.mulf %30, %31 : vector<4x256xf32>
    %33 = math.exp %32 : vector<4x256xf32>
    %34 = arith.mulf %13, %33 : vector<4x256xf32>
    %cst_10 = arith.constant 0.000000e+00 : f32
    %35 = vector.broadcast %cst_10 : f32 to vector<1x256xf32>
    %36 = arith.subf %35, %28 : vector<1x256xf32>
    %cst_11 = arith.constant 1.000000e+04 : f32
    %37 = vector.broadcast %cst_11 : f32 to vector<1x256xf32>
    %38 = arith.mulf %36, %37 : vector<1x256xf32>
    %39 = math.exp %38 : vector<1x256xf32>
    %cst_12 = arith.constant 1.00000095 : f32
    %40 = vector.broadcast %cst_12 : f32 to vector<1x256xf32>
    %41 = arith.mulf %39, %40 : vector<1x256xf32>
    %cst_13 = arith.constant 1.000000e-10 : f32
    %42 = vector.broadcast %cst_13 : f32 to vector<1x256xf32>
    %43 = arith.maximumf %41, %42 : vector<1x256xf32>
    %cst_14 = arith.constant dense<0.000000e+00> : vector<256xf32>
    %44 = vector.multi_reduction <add>, %34, %cst_14 [0] : vector<4x256xf32> to vector<256xf32>
    %45 = vector.shape_cast %44 : vector<256xf32> to vector<1x256xf32>
    %46 = arith.addf %45, %43 : vector<1x256xf32>
    %47 = tpu.reciprocal %46 {approx = true} : vector<1x256xf32> -> vector<1x256xf32>
    %48 = arith.mulf %46, %47 : vector<1x256xf32>
    %cst_15 = arith.constant 2.000000e+00 : f32
    %49 = vector.broadcast %cst_15 : f32 to vector<1x256xf32>
    %50 = arith.subf %49, %48 : vector<1x256xf32>
    %51 = arith.mulf %47, %50 : vector<1x256xf32>
    %c0_16 = arith.constant 0 : index
    %c0_17 = arith.constant 0 : index
    %52 = vector.load %arg1[%c0_16, %c0_17] : memref<12x256xf32, #tpu.memory_space<vmem>>, vector<4x256xf32>
    %53 = arith.mulf %34, %52 : vector<4x256xf32>
    %cst_18 = arith.constant dense<0.000000e+00> : vector<256xf32>
    %54 = vector.multi_reduction <add>, %53, %cst_18 [0] : vector<4x256xf32> to vector<256xf32>
    %55 = vector.shape_cast %54 : vector<256xf32> to vector<1x256xf32>
    %cst_19 = arith.constant 1.000000e+00 : f32
    %56 = vector.broadcast %cst_19 : f32 to vector<1x256xf32>
    %57 = arith.mulf %43, %56 : vector<1x256xf32>
    %58 = arith.addf %55, %57 : vector<1x256xf32>
    %59 = arith.mulf %58, %51 : vector<1x256xf32>
    %c4_20 = arith.constant 4 : index
    %c0_21 = arith.constant 0 : index
    %60 = vector.load %arg1[%c4_20, %c0_21] : memref<12x256xf32, #tpu.memory_space<vmem>>, vector<4x256xf32>
    %61 = arith.mulf %34, %60 : vector<4x256xf32>
    %cst_22 = arith.constant dense<0.000000e+00> : vector<256xf32>
    %62 = vector.multi_reduction <add>, %61, %cst_22 [0] : vector<4x256xf32> to vector<256xf32>
    %63 = vector.shape_cast %62 : vector<256xf32> to vector<1x256xf32>
    %cst_23 = arith.constant 1.000000e+00 : f32
    %64 = vector.broadcast %cst_23 : f32 to vector<1x256xf32>
    %65 = arith.mulf %43, %64 : vector<1x256xf32>
    %66 = arith.addf %63, %65 : vector<1x256xf32>
    %67 = arith.mulf %66, %51 : vector<1x256xf32>
    %c8 = arith.constant 8 : index
    %c0_24 = arith.constant 0 : index
    %68 = vector.load %arg1[%c8, %c0_24] : memref<12x256xf32, #tpu.memory_space<vmem>>, vector<4x256xf32>
    %69 = arith.mulf %34, %68 : vector<4x256xf32>
    %cst_25 = arith.constant dense<0.000000e+00> : vector<256xf32>
    %70 = vector.multi_reduction <add>, %69, %cst_25 [0] : vector<4x256xf32> to vector<256xf32>
    %71 = vector.shape_cast %70 : vector<256xf32> to vector<1x256xf32>
    %cst_26 = arith.constant 1.000000e+00 : f32
    %72 = vector.broadcast %cst_26 : f32 to vector<1x256xf32>
    %73 = arith.mulf %43, %72 : vector<1x256xf32>
    %74 = arith.addf %71, %73 : vector<1x256xf32>
    %75 = arith.mulf %74, %51 : vector<1x256xf32>
    %cst_27 = arith.constant 1.000000e+00 : f32
    %76 = vector.broadcast %cst_27 : f32 to vector<1x256xf32>
    %77 = arith.subf %76, %22 : vector<1x256xf32>
    %78 = tpu.concatenate %59, %67, %75, %77 in 0 : vector<1x256xf32>, vector<1x256xf32>, vector<1x256xf32>, vector<1x256xf32> -> vector<4x256xf32>
    %c0_28 = arith.constant 0 : index
    %c0_29 = arith.constant 0 : index
    %79 = vector.load %arg3[%c0_28, %c0_29] : memref<4x256xf32, #tpu.memory_space<vmem>>, vector<4x256xf32>
    tpu.vector_store %arg3[%c0_28, %c0_29], %78 {strides = array<i32>} : memref<4x256xf32, #tpu.memory_space<vmem>>, vector<4x256xf32>,
    return
  }
  func.func @transform_0(%arg0: i32) -> (i32, i32) {
    %c0_i32 = arith.constant 0 : i32
    %c0_i32_0 = arith.constant 0 : i32
    return %c0_i32, %arg0 : i32, i32
  }
  func.func @transform_1(%arg0: i32) -> (i32, i32) {
    %c0_i32 = arith.constant 0 : i32
    %c0_i32_0 = arith.constant 0 : i32
    return %c0_i32, %arg0 : i32, i32
  }
  func.func @transform_2(%arg0: i32) -> (i32, i32) {
    %c0_i32 = arith.constant 0 : i32
    %c0_i32_0 = arith.constant 0 : i32
    return %c0_i32, %arg0 : i32, i32
  }
}

</mosaic_0001>

<bundles_post_ra>
// kernel: soft_normal_shader.1
= control target key start
LH: loop header
LB: loop body
LE: loop exit
PB: predicated region body
PF: predicated region fallthrough
CT: control target
= control target key end

     0   :  { %s577_s9 = smov 0   ;;  %s579_s10 = smov 0   ;;  %s664_s0 = inlined_call_operand.vmem [shape: f32[12,512], index: 0, kind: input, shape index: {}]   ;;  %s665_s1 = inlined_call_operand.vmem [shape: f32[8,512], index: 1, kind: input, shape index: {}]   ;;  %s666_s2 = inlined_call_operand.vmem [shape: f32[4,512], index: 2, kind: output, shape index: {}]  }
   0x1   :  { %s581_s11 = smov 0  }
   0x2 LB: > { %s478_s12 = sadd.s32 4294967295, %s560_s11   ;;  %s594_s13 = sadd.s32 1, %s560_s11   ;;  %s560_s11 = sphi %s581_s11, %s669_s11   ;;  %s556_s10 = sphi %s579_s10, %s668_s10   ;;  %s552_s9 = sphi %s577_s9, %s667_s9  }
   0x3   : > { %s16_s14 = ssub.s32 %s560_s11, %s594_s13  ;;  %s19_s15 = sadd.s32 1, %s556_s10 }
   0x4   : > { %p17_p0 = scmp.eq.s32.totalorder %s16_s14, 0  ;;  %p26_p1 = scmp.ne.s32.totalorder %s556_s10, %s552_s9 }
   0x5   : > { %p27_p2 = scmp.eq.s32.totalorder %s560_s11, 0  ;;  %p481_p4 = scmp.ge.s32.totalorder %s560_s11, 2 }
   0x6   : > { %s603_s16 = scalar_select %p17_p0, %s556_s10, %s19_s15  }
   0x7   : > { %p28_p3 = por %p27_p2, %p26_p1  ;;  %104 = sbr.rel (%p481_p4) target bundleno = 21 (0x15), region = 16 }
   0xe   : > { %107 = sbr.rel (!%p28_p3) target bundleno = 21 (0x15), region = 20  ;;  %s109_s17 = sand.u32 (%p28_p3), 1, %s556_s10  }
   0xf   : > { %s493_s18 = sshll.u32 (%p28_p3), %s560_s11, 4  ;;  %s482_s19 = sshll.u32 (%p28_p3), %s109_s17, 5 }
  0x10   : > { %s114_s22 = scalar_lea.vmem (%p28_p3), %s664_s0, %s493_s18  ;;  %s111_s23 = scalar_lea.vmem (%p28_p3), [#allocation2], %s482_s19 }
  0x11   : > { %v127_v0 = vld [vmem:[%s114_s22] sm:$0xff] (%p28_p3)  ;;  %v129_v1 = vld [vmem:[%s114_s22 + $0x8] sm:$0xff] (%p28_p3) }
  0x12   : > { %v131_v2 = vld [vmem:[%s114_s22 + $0x20] sm:$0xff] (%p28_p3)  ;;  %128 = vst [vmem:[%s111_s23] sm:$0xff] (%p28_p3), %v127_v0  ;;  %130 = vst [vmem:[%s111_s23 + $0x8] sm:$0xff] (%p28_p3), %v129_v1  ;;  %v133_v3 = vld [vmem:[%s114_s22 + $0x28] sm:$0xff] (%p28_p3) }
  0x13   : > { %132 = vst [vmem:[%s111_s23 + $0x10] sm:$0xff] (%p28_p3), %v131_v2  ;;  %134 = vst [vmem:[%s111_s23 + $0x18] sm:$0xff] (%p28_p3), %v133_v3 }
  0x15 PF: > { %p485_p5 = scmp.ge.s32.totalorder %s560_s11, 1  ;;  %p148_p6 = scmp.lt.s32.totalorder %s560_s11, 3 }
  0x17   : > { %p149_p7 = pnand %p485_p5, %p148_p6 }
  0x18   : > { %s487_s24 = sshll.u32 (!%p149_p7), %s478_s12, 1  ;;  %vm242_vm0 = vcmask (!%p149_p7), 1047556   ;;  %s155_s29 = sand.u32 (!%p149_p7), 1, %s552_s9   ;;  %vm285_vm1 = vcmask (!%p149_p7), 1043456   ;;  %vm390_vm2 = vcmask (!%p149_p7), 1040384   ;;  %vm393_vm3 = vcmask (!%p149_p7), 1041408  }
  0x19   : > { %152 = sbr.rel (%p149_p7) target bundleno = 115 (0x73), region = 47  ;;  %p183_p8 = scmp.lt.s32.totalorder (!%p149_p7), %s487_s24, 3  ;;  %vm396_vm4 = vcmask (!%p149_p7), 1042432  }
  0x1a   : > { %s486_s30 = sshll.u32 (!%p149_p7), %s155_s29, 5 }
  0x1b   : > { %s157_s3 = scalar_lea.vmem (!%p149_p7), [#allocation2], %s486_s30 }
  0x1c   : > { %v332_v60 = vld [vmem:[%s157_s3] sm:$0xf0] (!%p149_p7)  ;;  %v333_v61 = vld [vmem:[%s157_s3 + $0x8] sm:$0xf0] (!%p149_p7)  ;;  %v310_v0 = vld [vmem:[%s157_s3] sm:$0xf] (!%p149_p7) }
  0x1d   : > { %v311_v2 = vld [vmem:[%s157_s3 + $0x8] sm:$0xf] (!%p149_p7)  ;;  %v336_v3 = vrot.slane (!%p149_p7), %v332_v60, 4 }
  0x20   : > { %s671_s24 = smov (!%p183_p8, %s487_s24), 3 }
  0x21   : > { %s488_s25 = sshll.u32 %s671_s24, 3  ;;  %s490_s4 = sshll.u32 %s671_s24, 2 }
  0x22   : > { %s186_s28 = scalar_lea.vmem %s665_s1, %s488_s25  ;;  %s192_s7 = scalar_lea.vmem %s666_s2, %s490_s4 }
  0x23   : > { %v194_v4 = vld [vmem:[%s186_s28] sm:$0xf]  ;;  %v195_v5 = vld [vmem:[%s186_s28 + $0x8] sm:$0xf]  ;;  %v196_v6 = vld [vmem:[%s186_s28] sm:$0xf0] }
  0x24   : > { %v197_v7 = vld [vmem:[%s186_s28 + $0x8] sm:$0xf0]  ;;  %v198_v8 = vmul.f32 10000.0, %v194_v4  ;;  %v199_v9 = vmul.f32 10000.0, %v195_v5  ;;  %v238_v10 = vsub.f32 100.0, %v196_v6  ;;  %v337_v4 = vrot.slane %v333_v61, 4 }
  0x25   : > { %v239_v11 = vsub.f32 100.0, %v197_v7 }
  0x26   : > { %v200_v12 = vmin.f32 %v198_v8, 80.0  ;;  %v201_v13 = vmin.f32 %v199_v9, 80.0  ;;  %v240_v14 = vmul.f32 0.01010101, %v238_v10 }
  0x27   : > { %v241_v15 = vmul.f32 0.01010101, %v239_v11 }
  0x28   : > { %v202_v16 = vmul.f32 1.442695, %v200_v12  ;;  %v204_v17 = vmul.f32 1.442695, %v201_v13  ;;  %v243_v18 = vsel %vm242_vm0, %v240_v14, -inf }
  0x29   : > { %v244_v19 = vrot.slane %v243_v18, 4  ;;  %v250_v20 = vsel %vm242_vm0, %v241_v15, -inf }
  0x2a   : > { %518 = vpow2.f32 %v202_v16  ;;  %v251_v21 = vrot.slane %v250_v20, 4 }
  0x2b   : > { %520 = vpow2.f32 %v204_v17  ;;  %v245_v22 = vmax.f32 %v243_v18, %v244_v19 }
  0x2c   : > { %v252_v23 = vmax.f32 %v250_v20, %v251_v21  ;;  %v360_v20 = vld [vmem:[%s157_s3 + $0x10] sm:$0xf]  ;;  %v361_v21 = vld [vmem:[%s157_s3 + $0x18] sm:$0xf] }
  0x2d   : > { %v246_v24 = vrot.slane %v245_v22, 2 }
  0x2e   : > { %v253_v25 = vrot.slane %v252_v23, 2 }
  0x2f   : > { %v247_v26 = vmax.f32 %v245_v22, %v246_v24 }
  0x30   : > { %v254_v27 = vmax.f32 %v252_v23, %v253_v25 }
  0x31   : > { %v248_v28 = vrot.slane %v247_v26, 1 }
  0x32   : > { %v255_v29 = vrot.slane %v254_v27, 1 }
  0x33   : > { %v249_v30 = vmax.f32 %v247_v26, %v248_v28 }
  0x34   : > { %v519_v31 = vpop.eup %518  ;;  %v256_v32 = vmax.f32 %v254_v27, %v255_v29 }
  0x35   : > { %v521_v33 = vpop.eup %520  ;;  %v206_v34 = vadd.f32 1.0, %v519_v31  ;;  %v257_v35 = vsub.f32 %v240_v14, %v249_v30  ;;  %v273_v36 = vsub.f32 0.0, %v249_v30 }
  0x36   : > { %v207_v37 = vadd.f32 1.0, %v521_v33  ;;  %v258_v38 = vsub.f32 %v241_v15, %v256_v32  ;;  %v274_v40 = vsub.f32 0.0, %v256_v32 }
  0x37   : > { %522 = vrcp.f32 %v206_v34  ;;  %v259_v39 = vmul.f32 10000.0, %v257_v35  ;;  %v275_v42 = vmul.f32 10000.0, %v273_v36 }
  0x38   : > { %524 = vrcp.f32 %v207_v37  ;;  %v260_v41 = vmul.f32 10000.0, %v258_v38  ;;  %v276_v45 = vmul.f32 10000.0, %v274_v40 }
  0x39   : > { %v261_v43 = vmul.f32 1.442695, %v259_v39  ;;  %v277_v46 = vmul.f32 1.442695, %v275_v42 }
  0x3a   : > { %v263_v44 = vmul.f32 1.442695, %v260_v41  ;;  %v279_v47 = vmul.f32 1.442695, %v276_v45 }
  0x3b   : > { %526 = vpow2.f32 %v261_v43 }
  0x3c   : > { %528 = vpow2.f32 %v263_v44 }
  0x3d   : > { %530 = vpow2.f32 %v277_v46 }
  0x3e   : > { %532 = vpow2.f32 %v279_v47 }
  0x41   : > { %v523_v48 = vpop.eup %522 }
  0x42   : > { %v525_v49 = vpop.eup %524  ;;  %v210_v50 = vmul.f32 %v523_v48, %v206_v34 }
  0x43   : > { %v211_v51 = vmul.f32 %v525_v49, %v207_v37 }
  0x44   : > { %v212_v52 = vsub.f32 2.0, %v210_v50 }
  0x45   : > { %v527_v53 = vpop.eup %526  ;;  %v213_v54 = vsub.f32 2.0, %v211_v51 }
  0x46   : > { %v529_v55 = vpop.eup %528  ;;  %v214_v56 = vmul.f32 %v523_v48, %v212_v52  ;;  %v267_v57 = vrot.slane %v527_v53, 4 }
  0x47   : > { %v215_v58 = vmul.f32 %v525_v49, %v213_v54  ;;  %v268_v59 = vrot.slane %v529_v55, 4  ;;  %v531_v1 = vpop.eup %530 }
  0x48   : > { %v271_v62 = vmul.f32 %v267_v57, %v214_v56  ;;  %v533_v8 = vpop.eup %532  ;;  %v281_v9 = vmul.f32 1.000001, %v531_v1  ;;  %v625_v16 = vsub.f32 1.0, %v214_v56 }
  0x49   : > { %v272_v63 = vmul.f32 %v268_v59, %v215_v58  ;;  %v282_v22 = vmul.f32 1.000001, %v533_v8  ;;  %v217_v26 = vsub.f32 1.0, %v215_v58 }
  0x4a   : > { %v286_v5 = vsel %vm285_vm1, %v271_v62, 0.0  ;;  %v312_v7 = vmul.f32 %v310_v0, %v271_v62  ;;  %v340_v14 = vmul.f32 %v336_v3, %v271_v62  ;;  %v630_v27 = vmax.f32 %v281_v9, 1e-10 }
  0x4b   : > { %v293_v6 = vsel %vm285_vm1, %v272_v63, 0.0  ;;  %v287_v10 = vrot.slane %v286_v5, 4  ;;  %v313_v12 = vmul.f32 %v311_v2, %v272_v63  ;;  %v341_v15 = vmul.f32 %v337_v4, %v272_v63 }
  0x4c   : > { %v294_v11 = vrot.slane %v293_v6, 4  ;;  %v314_v13 = vsel %vm285_vm1, %v312_v7, 0.0  ;;  %v342_v24 = vsel %vm285_vm1, %v340_v14, 0.0  ;;  %v362_v33 = vmul.f32 %v360_v20, %v271_v62 }
  0x4d   : > { %v288_v17 = vadd.f32 %v287_v10, %v286_v5  ;;  %v315_v19 = vrot.slane %v314_v13, 4  ;;  %v321_v23 = vsel %vm285_vm1, %v313_v12, 0.0  ;;  %v349_v25 = vsel %vm285_vm1, %v341_v15, 0.0 }
  0x4e   : > { %v295_v18 = vadd.f32 %v294_v11, %v293_v6  ;;  %v322_v30 = vrot.slane %v321_v23, 4  ;;  %v343_v31 = vrot.slane %v342_v24, 4  ;;  %v350_v32 = vrot.slane %v349_v25, 4 }
  0x4f   : > { %v289_v28 = vrot.slane %v288_v17, 2  ;;  %v316_v36 = vadd.f32 %v315_v19, %v314_v13  ;;  %v363_v37 = vmul.f32 %v361_v21, %v272_v63  ;;  %v632_v38 = vmax.f32 %v282_v22, 1e-10 }
  0x50   : > { %v296_v29 = vrot.slane %v295_v18, 2  ;;  %v323_v39 = vadd.f32 %v322_v30, %v321_v23  ;;  %v344_v40 = vadd.f32 %v343_v31, %v342_v24  ;;  %v364_v41 = vsel %vm285_vm1, %v362_v33, 0.0 }
  0x51   : > { %v290_v34 = vadd.f32 %v289_v28, %v288_v17  ;;  %v351_v44 = vadd.f32 %v350_v32, %v349_v25  ;;  %v365_v45 = vrot.slane %v364_v41, 4  ;;  %v220_v46 = vrot.slane %v625_v16, 1 }
  0x52   : > { %v297_v35 = vadd.f32 %v296_v29, %v295_v18  ;;  %v371_v47 = vsel %vm285_vm1, %v363_v37, 0.0  ;;  %v317_v50 = vrot.slane %v316_v36, 2  ;;  %v221_v52 = vrot.slane %v217_v26, 1 }
  0x53   : > { %v291_v42 = vrot.slane %v290_v34, 1  ;;  %v366_v51 = vadd.f32 %v365_v45, %v364_v41  ;;  %v324_v53 = vrot.slane %v323_v39, 2  ;;  %v345_v54 = vrot.slane %v344_v40, 2 }
  0x54   : > { %v298_v43 = vrot.slane %v297_v35, 1  ;;  %v372_v55 = vrot.slane %v371_v47, 4  ;;  %v352_v58 = vrot.slane %v351_v44, 2  ;;  %v226_v60 = vrot.slane %v625_v16, 2 }
  0x55   : > { %v292_v48 = vadd.f32 %v291_v42, %v290_v34  ;;  %v367_v59 = vrot.slane %v366_v51, 2  ;;  %v224_v62 = vmul.f32 %v220_v46, %v625_v16  ;;  %v227_v63 = vrot.slane %v217_v26, 2 }
  0x56   : > { %v299_v49 = vadd.f32 %v298_v43, %v297_v35  ;;  %v373_v61 = vadd.f32 %v372_v55, %v371_v47  ;;  %v318_v0 = vadd.f32 %v317_v50, %v316_v36  ;;  %v225_v1 = vmul.f32 %v221_v52, %v217_v26 }
  0x57   : > { %v300_v56 = vadd.f32 %v292_v48, %v630_v27  ;;  %v346_v2 = vadd.f32 %v345_v54, %v344_v40  ;;  %v368_v3 = vadd.f32 %v367_v59, %v366_v51  ;;  %v325_v4 = vadd.f32 %v324_v53, %v323_v39 }
  0x58   : > { %v301_v57 = vadd.f32 %v299_v49, %v632_v38  ;;  %v353_v5 = vadd.f32 %v352_v58, %v351_v44  ;;  %v374_v6 = vrot.slane %v373_v61, 2  ;;  %v230_v7 = vmul.f32 %v226_v60, %v224_v62 }
  0x59   : > { %534 = vrcp.f32 %v300_v56  ;;  %v232_v8 = vrot.slane %v625_v16, 3  ;;  %v319_v9 = vrot.slane %v318_v0, 1  ;;  %v231_v11 = vmul.f32 %v227_v63, %v225_v1 }
  0x5a   : > { %536 = vrcp.f32 %v301_v57  ;;  %v375_v10 = vadd.f32 %v374_v6, %v373_v61  ;;  %v233_v12 = vrot.slane %v217_v26, 3  ;;  %v347_v13 = vrot.slane %v346_v2, 1 }
  0x5b   : > { %v369_v14 = vrot.slane %v368_v3, 1  ;;  %v326_v15 = vrot.slane %v325_v4, 1  ;;  %v354_v17 = vrot.slane %v353_v5, 1  ;;  %v236_v19 = vmul.f32 %v232_v8, %v230_v7 }
  0x5c   : > { %v376_v18 = vrot.slane %v375_v10, 1  ;;  %v320_v20 = vadd.f32 %v319_v9, %v318_v0  ;;  %v237_v21 = vmul.f32 %v233_v12, %v231_v11  ;;  %v348_v22 = vadd.f32 %v347_v13, %v346_v2 }
  0x5d   : > { %v370_v23 = vadd.f32 %v369_v14, %v368_v3  ;;  %v327_v25 = vadd.f32 %v326_v15, %v325_v4  ;;  %v355_v28 = vadd.f32 %v354_v17, %v353_v5  ;;  %v382_v26 = vsub.f32 1.0, %v236_v19 }
  0x5e   : > { %v377_v29 = vadd.f32 %v376_v18, %v375_v10  ;;  %v328_v32 = vadd.f32 %v320_v20, %v630_v27  ;;  %v356_v34 = vadd.f32 %v348_v22, %v630_v27  ;;  %v383_v36 = vsub.f32 1.0, %v237_v21 }
  0x5f   : > { %v378_v35 = vadd.f32 %v370_v23, %v630_v27  ;;  %v329_v39 = vadd.f32 %v327_v25, %v632_v38  ;;  %v357_v40 = vadd.f32 %v355_v28, %v632_v38  ;;  %v386_v47 = vrot.slane %v382_v26, 5 }
  0x60   : > { %v379_v41 = vadd.f32 %v377_v29, %v632_v38  ;;  %v387_v50 = vrot.slane %v383_v36, 5 }
  0x63   : > { %v535_v24 = vpop.eup %534 }
  0x64   : > { %v537_v30 = vpop.eup %536  ;;  %v304_v16 = vmul.f32 %v535_v24, %v300_v56 }
  0x65   : > { %v305_v31 = vmul.f32 %v537_v30, %v301_v57 }
  0x66   : > { %v306_v33 = vsub.f32 2.0, %v304_v16 }
  0x67   : > { %v307_v37 = vsub.f32 2.0, %v305_v31 }
  0x68   : > { %v308_v42 = vmul.f32 %v535_v24, %v306_v33 }
  0x69   : > { %v309_v43 = vmul.f32 %v537_v30, %v307_v37 }
  0x6a   : > { %v330_v44 = vmul.f32 %v328_v32, %v308_v42  ;;  %v358_v45 = vmul.f32 %v356_v34, %v308_v42  ;;  %v380_v46 = vmul.f32 %v378_v35, %v308_v42 }
  0x6b   : > { %v331_v48 = vmul.f32 %v329_v39, %v309_v43  ;;  %v359_v27 = vmul.f32 %v357_v40, %v309_v43  ;;  %v381_v49 = vmul.f32 %v379_v41, %v309_v43 }
  0x6c   : > { %v391_v51 = vsel %vm390_vm2, %v330_v44, %v358_v45 }
  0x6d   : > { %v392_v52 = vsel %vm390_vm2, %v331_v48, %v359_v27  ;;  %v394_v53 = vsel %vm393_vm3, %v391_v51, %v380_v46 }
  0x6e   : > { %v395_v54 = vsel %vm393_vm3, %v392_v52, %v381_v49  ;;  %v397_v38 = vsel %vm396_vm4, %v394_v53, %v386_v47 }
  0x6f   : > { %v398_v55 = vsel %vm396_vm4, %v395_v54, %v387_v50 }
  0x70   : > { %v401_v56 = vcombine.low %v397_v38, %v398_v55 }
  0x72   : > { %403 = vst [vmem:[%s192_s7] sm:$0xff] %v401_v56 }
  0x73 PF: > { %p9_p9 = scmp.ge.s32.totalorder %s594_s13, 4   ;;  %s667_s9 = smov %s556_s10 }
  0x74   : > { %s668_s10 = smov %s603_s16  ;;  %s669_s11 = smov %s594_s13 }
  0x75   :  { %11 = sbr.rel (!%p9_p9) target bundleno = 2 (0x2), region = 89 }

</bundles_post_ra>
